<compile_context>
chip_gen: v7x
topology: tpu7x:2x2x1
jax: 0.10.0
libtpu: 0.0.40
codegen_flags: <defaults>
</compile_context>

<pallas_src>
import jax
import jax.numpy as jnp
from jax import lax
from jax.experimental import pallas as pl
from jax.experimental.pallas import tpu as pltpu


def abs_pos_emb_kernel(q_ref, k_ref, emb_ref, o_ref):
    # q_ref: (G, HW, D)  k_ref: (G, HW, D)  emb_ref: (HW, D)  o_ref: (G, HW, HW)
    kv = k_ref[...] + emb_ref[...][None, :, :]          # fused positional add (VPU)
    # Batched contraction on the last dims; transpose handled by the MXU.
    o_ref[...] = lax.dot_general(
        q_ref[...], kv,
        dimension_numbers=(((2,), (2,)), ((0,), (0,))),
        preferred_element_type=jnp.float32,
    )


def _choose_group(bn, hw, d, itemsize=4, vmem_budget_bytes=8 * 1024 * 1024):
    """Largest divisor G of bn whose per-step footprint fits the budget, while
    keeping >= 2 grid steps when possible (v7x has 2 TensorCores)."""
    best = 1
    for g in range(1, bn + 1):
        if bn % g != 0:
            continue
        steps = bn // g
        # double-buffered q, k, out + single constant emb block
        bytes_needed = (2 * (2 * g * hw * d + g * hw * hw) + hw * d) * itemsize
        if bytes_needed > vmem_budget_bytes:
            continue
        if steps >= 2 or bn < 2:
            best = g
    return best


def absolute_pos_emb(q, k, h_emb, w_emb):
    """Pallas implementation of AbsolutePosEmb.forward.

    q, k: (B, N, H, W, D) float32
    h_emb: (H, D), w_emb: (W, D)
    returns: (B, N, H, W, H, W) float32
    """
    B, N, H, W, D = q.shape
    HW = H * W
    BN = B * N

    # Glue: emb = h[:,None,:] + w[None,:,:], flattened (cheap, plain JAX).
    emb = (h_emb[:, None, :] + w_emb[None, :, :]).reshape(HW, D)
    qf = q.reshape(BN, HW, D)
    kf = k.reshape(BN, HW, D)

    G = _choose_group(BN, HW, D)
    grid = (BN // G,)

    out = pl.pallas_call(
        abs_pos_emb_kernel,
        out_shape=jax.ShapeDtypeStruct((BN, HW, HW), jnp.float32),
        grid_spec=pltpu.PrefetchScalarGridSpec(
            num_scalar_prefetch=0,
            grid=grid,
            in_specs=[
                pl.BlockSpec((G, HW, D), lambda i: (i, 0, 0)),
                pl.BlockSpec((G, HW, D), lambda i: (i, 0, 0)),
                # Constant block index across the grid: emb stays resident.
                pl.BlockSpec((HW, D), lambda i: (0, 0)),
            ],
            out_specs=pl.BlockSpec((G, HW, HW), lambda i: (i, 0, 0)),
        ),
        compiler_params=pltpu.CompilerParams(
            dimension_semantics=("parallel",),
        ),
    )(qf, kf, emb)

    return out.reshape(B, N, H, W, H, W)


def reference(q, k, h_emb, w_emb):
    logits = jnp.einsum('bnhwd,bnpqd->bnhwpq', q, k)
    emb = h_emb[:, None, :] + w_emb[None, :, :]
    abs_logits = jnp.einsum('bhxyd,pqd->bhxypq', q, emb)
    return logits + abs_logits


if __name__ == "__main__":
    B, N = 2, 2          # batch, heads
    H, W = 8, 8          # fmap_dim
    D = 32               # head_dim
    scale = D ** (-0.5)

    key = jax.random.PRNGKey(0)
    k_h, k_w, k_q, k_k = jax.random.split(key, 4)

    # nn.init.normal_(param, self.scale) -> mean = scale, std = 1.0
    h_emb = jax.random.normal(k_h, (H, D), jnp.float32) + scale
    w_emb = jax.random.normal(k_w, (W, D), jnp.float32) + scale

    q = jax.random.normal(k_q, (B, N, H, W, D), jnp.float32)
    k = jax.random.normal(k_k, (B, N, H, W, D), jnp.float32)

    out = absolute_pos_emb(q, k, h_emb, w_emb)
    out = jax.block_until_ready(out)

    ref = reference(q, k, h_emb, w_emb)
    assert out.shape == (B, N, H, W, H, W)
    assert jnp.allclose(out, ref, atol=1e-4, rtol=1e-4)

    print("KERNEL_OK")
</pallas_src>

<mosaic_0001>
module attributes {stable_mosaic.version = 11 : i64} {
  func.func @abs_pos_emb_kernel(%arg0: i32, %arg1: memref<2x64x32xf32, #tpu.memory_space<vmem>>, %arg2: memref<2x64x32xf32, #tpu.memory_space<vmem>>, %arg3: memref<64x32xf32, #tpu.memory_space<vmem>>, %arg4: memref<2x64x64xf32, #tpu.memory_space<vmem>>) attributes {dimension_semantics = [#tpu.dimension_semantics<parallel>], iteration_bounds = array<i64: 2>, scalar_prefetch = 0 : i64, scratch_operands = 0 : i64, tpu.core_type = #tpu.core_type<tc>, window_params = [{transform_indices = @transform_0, window_bounds = array<i64: 2, 64, 32>}, {transform_indices = @transform_1, window_bounds = array<i64: 2, 64, 32>}, {pipeline_mode = #tpu.pipeline_mode<synchronous>, transform_indices = @transform_2, window_bounds = array<i64: 64, 32>}, {transform_indices = @transform_3, window_bounds = array<i64: 2, 64, 64>}]} {
    %c0 = arith.constant 0 : index
    %c0_0 = arith.constant 0 : index
    %c0_1 = arith.constant 0 : index
    %0 = vector.load %arg2[%c0, %c0_0, %c0_1] : memref<2x64x32xf32, #tpu.memory_space<vmem>>, vector<2x64x32xf32>
    %c0_2 = arith.constant 0 : index
    %c0_3 = arith.constant 0 : index
    %1 = vector.load %arg3[%c0_2, %c0_3] : memref<64x32xf32, #tpu.memory_space<vmem>>, vector<64x32xf32>
    %2 = vector.shape_cast %1 : vector<64x32xf32> to vector<1x64x32xf32>
    %3 = vector.broadcast %2 : vector<1x64x32xf32> to vector<2x64x32xf32>
    %4 = arith.addf %0, %3 : vector<2x64x32xf32>
    %c0_4 = arith.constant 0 : index
    %c0_5 = arith.constant 0 : index
    %c0_6 = arith.constant 0 : index
    %5 = vector.load %arg1[%c0_4, %c0_5, %c0_6] : memref<2x64x32xf32, #tpu.memory_space<vmem>>, vector<2x64x32xf32>
    %cst = arith.constant dense<0.000000e+00> : vector<2x64x64xf32>
    %6 = tpu.matmul %5, %4, %cst {dimension_numbers = #tpu.dot_dimension_numbers<[2], [2], [1], [1], [0, 0, 0, 1, 1, 1], [0], [0]>} : vector<2x64x32xf32>, vector<2x64x32xf32>, vector<2x64x64xf32> -> vector<2x64x64xf32>
    %c0_7 = arith.constant 0 : index
    %c0_8 = arith.constant 0 : index
    %c0_9 = arith.constant 0 : index
    %7 = vector.load %arg4[%c0_7, %c0_8, %c0_9] : memref<2x64x64xf32, #tpu.memory_space<vmem>>, vector<2x64x64xf32>
    tpu.vector_store %arg4[%c0_7, %c0_8, %c0_9], %6 {strides = array<i32>} : memref<2x64x64xf32, #tpu.memory_space<vmem>>, vector<2x64x64xf32>,
    return
  }
  func.func @transform_0(%arg0: i32) -> (i32, i32, i32) {
    %c0_i32 = arith.constant 0 : i32
    %c0_i32_0 = arith.constant 0 : i32
    %c0_i32_1 = arith.constant 0 : i32
    return %arg0, %c0_i32, %c0_i32_0 : i32, i32, i32
  }
  func.func @transform_1(%arg0: i32) -> (i32, i32, i32) {
    %c0_i32 = arith.constant 0 : i32
    %c0_i32_0 = arith.constant 0 : i32
    %c0_i32_1 = arith.constant 0 : i32
    return %arg0, %c0_i32, %c0_i32_0 : i32, i32, i32
  }
  func.func @transform_2(%arg0: i32) -> (i32, i32) {
    %c0_i32 = arith.constant 0 : i32
    %c0_i32_0 = arith.constant 0 : i32
    %c0_i32_1 = arith.constant 0 : i32
    return %c0_i32, %c0_i32_0 : i32, i32
  }
  func.func @transform_3(%arg0: i32) -> (i32, i32, i32) {
    %c0_i32 = arith.constant 0 : i32
    %c0_i32_0 = arith.constant 0 : i32
    %c0_i32_1 = arith.constant 0 : i32
    return %arg0, %c0_i32, %c0_i32_0 : i32, i32, i32
  }
}

</mosaic_0001>

<bundles_post_ra>
// kernel: tpu_custom_call.1
= control target key start
LH: loop header
LB: loop body
LE: loop exit
PB: predicated region body
PF: predicated region fallthrough
CT: control target
= control target key end

     0   :  { %8 = vsyncpa [#allocation3], 0  ;;  %s1244_s0 = inlined_call_operand.vmem [shape: f32[4,64,32], index: 0, kind: input, shape index: {}]   ;;  %s1245_s1 = inlined_call_operand.vmem [shape: f32[4,64,32], index: 1, kind: input, shape index: {}]   ;;  %s1246_s2 = inlined_call_operand.vmem [shape: f32[64,32], index: 2, kind: input, shape index: {}]   ;;  %s1247_s3 = inlined_call_operand.hbm [shape: f32[4,64,64], index: 3, kind: output, shape index: {}]  }
   0x1   :  { %10 = vsyncpa [#allocation3 + $0x1], 0  ;;  %s986_s12 = smov 0   ;;  %s988_s13 = smov 0  }
   0x2   :  { %s990_s14 = smov 0   ;;  %s992_s15 = smov 0  }
   0x3 LB: > { %s1007_s16 = sadd.s32 4294967295, %s961_s15   ;;  %s669_s17 = sadd.s32 4294967294, %s961_s15   ;;  %s961_s15 = sphi %s992_s15, %s1255_s15   ;;  %s957_s14 = sphi %s990_s14, %s1254_s14   ;;  %s953_s13 = sphi %s988_s13, %s1253_s13   ;;  %s949_s12 = sphi %s986_s12, %s1252_s12  }
   0x4   : > { %s1011_s18 = sadd.s32 1, %s961_s15   ;;  %s96_s19 = sadd.s32 1, %s957_s14 }
   0x5   : > { %s93_s20 = ssub.s32 %s961_s15, %s1011_s18  ;;  %p106_p0 = scmp.ne.s32.totalorder %s957_s14, %s953_s13 }
   0x6   : > { %p94_p1 = scmp.eq.s32.totalorder %s93_s20, 0  ;;  %p107_p2 = scmp.eq.s32.totalorder %s1007_s16, 1 }
   0x7   : > { %p112_p3 = scmp.ne.s32.totalorder %s953_s13, %s949_s12  ;;  %p113_p4 = scmp.eq.s32.totalorder %s669_s17, 1 }
   0x8   : > { %s1022_s21 = scalar_select %p94_p1, %s957_s14, %s96_s19  }
   0x9   : > { %p1024_p5 = por %p107_p2, %p106_p0  ;;  %p1028_p6 = por %p113_p4, %p112_p3 }
   0xa   : > { %p672_p7 = scmp.ge.s32.totalorder %s961_s15, 1  ;;  %p154_p8 = scmp.lt.s32.totalorder %s961_s15, 3 }
   0xc   : > { %p155_p9 = pnand %p672_p7, %p154_p8 }
   0xd   : > { %s674_s24 = sshll.u32 (!%p155_p9), %s1007_s16, 1  ;;  %v216_v0 = vld [vmem:[%s1246_s2] sm:$0xff] (!%p155_p9)  ;;  %v217_v1 = vld [vmem:[%s1246_s2 + $0x8] sm:$0xff] (!%p155_p9)  ;;  %vm256_vm0 = vcmask (!%p155_p9), 261120   ;;  %v218_v2 = vld [vmem:[%s1246_s2 + $0x10] sm:$0xff] (!%p155_p9)  ;;  %s182_s30 = sand.u32 (!%p155_p9), 1, %s953_s13  }
   0xe   : > { %158 = sbr.rel (%p155_p9) target bundleno = 302 (0x12e), region = 32  ;;  %p186_p10 = scmp.lt.s32.totalorder (!%p155_p9), %s674_s24, 3  ;;  %v219_v3 = vld [vmem:[%s1246_s2 + $0x18] sm:$0xff] (!%p155_p9)  ;;  %vm1060_vm1 = vmpackc.low (!%p155_p9), %vm256_vm0, %vm256_vm0  ;;  %v220_v22 = vld [vmem:[%s1246_s2 + $0x20] sm:$0xff] (!%p155_p9)  ;;  %vm563_vm2 = vcmask (!%p155_p9), 523264  }
   0xf   : > { %v221_v27 = vld [vmem:[%s1246_s2 + $0x28] sm:$0xff] (!%p155_p9)  ;;  %v222_v38 = vld [vmem:[%s1246_s2 + $0x30] sm:$0xff] (!%p155_p9)  ;;  %v223_v42 = vld [vmem:[%s1246_s2 + $0x38] sm:$0xff] (!%p155_p9)  ;;  %s673_s4 = sshll.u32 (!%p155_p9), %s182_s30, 7  ;;  %s721_s6 = sshll.u32 (!%p155_p9), %s1007_s16, 11 }
  0x10   : > { %s1189_s10 = scalar_lea.hbm (!%p155_p9), %s1247_s3, %s721_s6  ;;  %s1203_s16 = scalar_lea.sflag (!%p155_p9), [#allocation3], %s182_s30 }
  0x15   : > { %s1257_s24 = smov (!%p186_p10, %s674_s24), 3 }
  0x16   : > { %s718_s25 = sshll.u32 %s1257_s24, 6 }
  0x17   : > { %s1044_s5 = scalar_lea.vmem %s1245_s1, %s718_s25  ;;  %s1069_s17 = scalar_lea.vmem %s1244_s0, %s718_s25 }
  0x18   : > { %v200_v4 = vld [vmem:[%s1044_s5] sm:$0xff]  ;;  %v201_v5 = vld [vmem:[%s1044_s5 + $0x8] sm:$0xff]  ;;  %v202_v11 = vld [vmem:[%s1044_s5 + $0x10] sm:$0xff] }
  0x19   : > { %v208_v6 = vld [vmem:[%s1044_s5 + $0x40] sm:$0xff]  ;;  %v224_v7 = vadd.f32 %v216_v0, %v200_v4  ;;  %v225_v8 = vadd.f32 %v217_v1, %v201_v5  ;;  %v209_v9 = vld [vmem:[%s1044_s5 + $0x48] sm:$0xff]  ;;  %v203_v12 = vld [vmem:[%s1044_s5 + $0x18] sm:$0xff]  ;;  %v226_v15 = vadd.f32 %v218_v2, %v202_v11 }
  0x1a   : > { %v232_v10 = vadd.f32 %v216_v0, %v208_v6  ;;  %v233_v14 = vadd.f32 %v217_v1, %v209_v9  ;;  %v227_v16 = vadd.f32 %v219_v3, %v203_v12  ;;  %v210_v17 = vld [vmem:[%s1044_s5 + $0x50] sm:$0xff]  ;;  %v211_v18 = vld [vmem:[%s1044_s5 + $0x58] sm:$0xff]  ;;  %v204_v25 = vld [vmem:[%s1044_s5 + $0x20] sm:$0xff] }
  0x1b   : > { %v810_v19 = vpack.c.bf16 %v225_v8, %v224_v7  ;;  %v234_v20 = vadd.f32 %v218_v2, %v210_v17  ;;  %v235_v21 = vadd.f32 %v219_v3, %v211_v18  ;;  %v205_v26 = vld [vmem:[%s1044_s5 + $0x28] sm:$0xff]  ;;  %v212_v29 = vld [vmem:[%s1044_s5 + $0x60] sm:$0xff]  ;;  %v228_v33 = vadd.f32 %v220_v22, %v204_v25  ;;  %v206_v40 = vld [vmem:[%s1044_s5 + $0x30] sm:$0xff] }
  0x1c   : > { %v834_v23 = vpack.c.bf16 %v233_v14, %v232_v10  ;;  %v816_v24 = vpack.c.bf16 %v227_v16, %v226_v15  ;;  %v213_v30 = vld [vmem:[%s1044_s5 + $0x68] sm:$0xff]  ;;  %v240_v31 = vld [vmem:[%s1069_s17] sm:$0xff]  ;;  %v229_v34 = vadd.f32 %v221_v27, %v205_v26  ;;  %v236_v35 = vadd.f32 %v220_v22, %v212_v29  ;;  %v207_v41 = vld [vmem:[%s1044_s5 + $0x38] sm:$0xff] }
  0x1d   : > { %812 = vmatprep.subr.msk.bf16.mxu0 %vm1060_vm1, %v810_v19  ;;  %v840_v28 = vpack.c.bf16 %v235_v21, %v234_v20  ;;  %v248_v32 = vld [vmem:[%s1069_s17 + $0x40] sm:$0xff]  ;;  %v237_v36 = vadd.f32 %v221_v27, %v213_v30  ;;  %770 = vmatprep.mubr.msk.f32.mxu0 %vm256_vm0, %v240_v31  ;;  %v214_v43 = vld [vmem:[%s1044_s5 + $0x70] sm:$0xff]  ;;  %v215_v44 = vld [vmem:[%s1044_s5 + $0x78] sm:$0xff]  ;;  %v230_v45 = vadd.f32 %v222_v38, %v206_v40  ;;  %s1158_s5 = scalar_lea.vmem [#allocation2], %s673_s4 }
  0x1e   : > { %836 = vmatprep.subr.msk.bf16.mxu1 %vm1060_vm1, %v834_v23  ;;  %815 = vmatpush3.bf16.xpose.msk.msra.mxu0 %vm1060_vm1, %v810_v19  ;;  %v822_v37 = vpack.c.bf16 %v229_v34, %v228_v33  ;;  %v231_v46 = vadd.f32 %v223_v42, %v207_v41  ;;  %v238_v47 = vadd.f32 %v222_v38, %v214_v43  ;;  %v241_v51 = vld [vmem:[%s1069_s17 + $0x8] sm:$0xff]  ;;  %v242_v53 = vld [vmem:[%s1069_s17 + $0x10] sm:$0xff]  ;;  %v243_v55 = vld [vmem:[%s1069_s17 + $0x18] sm:$0xff]  ;;  %s595_s7 = sshll.u32 %s1158_s5, 4  ;;  %s1191_s7 = int_to_ptr.vmem [resolvable:$true] %s595_s7 }
  0x1f   : > { %839 = vmatpush3.bf16.xpose.msk.msra.mxu1 %vm1060_vm1, %v834_v23  ;;  %818 = vmatprep.subr.msk.bf16.mxu0 %vm1060_vm1, %v816_v24  ;;  %v846_v39 = vpack.c.bf16 %v237_v36, %v236_v35  ;;  %v239_v48 = vadd.f32 %v223_v42, %v215_v44  ;;  %v249_v52 = vld [vmem:[%s1069_s17 + $0x48] sm:$0xff]  ;;  %v250_v54 = vld [vmem:[%s1069_s17 + $0x50] sm:$0xff]  ;;  %v251_v56 = vld [vmem:[%s1069_s17 + $0x58] sm:$0xff]  ;;  %s899_s11 = scalar_lea.vmem %s1191_s7, 2048 }
  0x20   : > { %842 = vmatprep.subr.msk.bf16.mxu1 %vm1060_vm1, %v840_v28  ;;  %798 = vmatprep.mubr.msk.f32.mxu1 %vm256_vm0, %v248_v32  ;;  %v828_v49 = vpack.c.bf16 %v231_v46, %v230_v45  ;;  %v244_v57 = vld [vmem:[%s1069_s17 + $0x20] sm:$0xff]  ;;  %v245_v59 = vld [vmem:[%s1069_s17 + $0x28] sm:$0xff]  ;;  %v246_v61 = vld [vmem:[%s1069_s17 + $0x30] sm:$0xff]  ;;  %p900_p11 = scmp.ne.s32.totalorder %s1191_s7, %s899_s11 }
  0x21   : > { %v852_v50 = vpack.c.bf16 %v239_v48, %v238_v47  ;;  %v252_v58 = vld [vmem:[%s1069_s17 + $0x60] sm:$0xff]  ;;  %v253_v60 = vld [vmem:[%s1069_s17 + $0x68] sm:$0xff]  ;;  %v254_v62 = vld [vmem:[%s1069_s17 + $0x70] sm:$0xff] }
  0x22   : > { %v247_v63 = vld [vmem:[%s1069_s17 + $0x38] sm:$0xff]  ;;  %p901_p12 = pnand %p900_p11, %p1024_p5 }
  0x23   : > { %v255_v0 = vld [vmem:[%s1069_s17 + $0x78] sm:$0xff]  ;;  %s963_s17 = smov [#allocation2]  }
  0x24   : > { %p902_p13 = pneg %p901_p12  ;;  %s903_s19 = sshll.u32 %s963_s17, 4  ;;  %s904_s19 = int_to_ptr.vmem [resolvable:$false] %s903_s19 }
  0x25   : > { %s905_s20 = scalar_lea.vmem %s904_s19, 4096  ;;  %p906_p0 = scmp.lt.s32.totalorder %s1191_s7, %s904_s19 }
  0x26   : > { %821 = vmatpush3.bf16.xpose.msk.msra.mxu0 %vm1060_vm1, %v816_v24  ;;  %p907_p1 = scmp.lt.s32.totalorder %s905_s20, %s899_s11 }
  0x27   : > { %845 = vmatpush3.bf16.xpose.msk.msra.mxu1 %vm1060_vm1, %v840_v28  ;;  %824 = vmatprep.subr.msk.bf16.mxu0 %vm1060_vm1, %v822_v37 }
  0x28   : > { %848 = vmatprep.subr.msk.bf16.mxu1 %vm1060_vm1, %v846_v39  ;;  %p908_p2 = por %p907_p1, %p906_p0 }
  0x2a   : > { %p909_p3 = pnand %p908_p2, %p902_p13 }
  0x2e   : > { %827 = vmatpush3.bf16.xpose.msk.msra.mxu0 %vm1060_vm1, %v822_v37 }
  0x2f   : > { %851 = vmatpush3.bf16.xpose.msk.msra.mxu1 %vm1060_vm1, %v846_v39  ;;  %830 = vmatprep.subr.msk.bf16.mxu0 %vm1060_vm1, %v828_v49 }
  0x30   : > { %854 = vmatprep.subr.msk.bf16.mxu1 %vm1060_vm1, %v852_v50 }
  0x36   : > { %833 = vmatpush3.bf16.xpose.msk.msra.mxu0 %vm1060_vm1, %v828_v49 }
  0x37   : > { %857 = vmatpush3.bf16.xpose.msk.msra.mxu1 %vm1060_vm1, %v852_v50 }
  0x3d   : > { %771 = vmatmul.mubr.msk.f32.vlgmr.msra.gmra.mrb[0].mxu0 %vm256_vm0, %v241_v51 }
  0x3e   : > { %799 = vmatmul.mubr.msk.f32.vlgmr.msra.gmra.mrb[0].mxu1 %vm256_vm0, %v249_v52  ;;  %773 = vmatprep.mubr.msk.f32.mxu0 %vm256_vm0, %v242_v53 }
  0x3f   : > { %801 = vmatprep.mubr.msk.f32.mxu1 %vm256_vm0, %v250_v54 }
  0x41   : > { %774 = vmatmul.mubr.msk.f32.gmra.mrb[2].mxu0 %vm256_vm0, %v243_v55 }
  0x42   : > { %802 = vmatmul.mubr.msk.f32.gmra.mrb[2].mxu1 %vm256_vm0, %v251_v56  ;;  %776 = vmatprep.mubr.msk.f32.mxu0 %vm256_vm0, %v244_v57 }
  0x43   : > { %804 = vmatprep.mubr.msk.f32.mxu1 %vm256_vm0, %v252_v58 }
  0x45   : > { %777 = vmatmul.mubr.msk.f32.gmra.mrb[4].mxu0 %vm256_vm0, %v245_v59 }
  0x46   : > { %805 = vmatmul.mubr.msk.f32.gmra.mrb[4].mxu1 %vm256_vm0, %v253_v60  ;;  %779 = vmatprep.mubr.msk.f32.mxu0 %vm256_vm0, %v246_v61 }
  0x47   : > { %807 = vmatprep.mubr.msk.f32.mxu1 %vm256_vm0, %v254_v62 }
  0x49   : > { %780 = vmatmul.mubr.msk.f32.gmra.mrb[6].mxu0 %vm256_vm0, %v247_v63 }
  0x4a   : > { %808 = vmatmul.mubr.msk.f32.gmra.mrb[6].mxu1 %vm256_vm0, %v255_v0 }
 0x110   : > { %v772_v1 = vpop.f32.mrb[0].mxu0 }
 0x111   : > { %565 = vst.msk [vmem:[%s1158_s5 + $0x8] sm:$0xff] %vm563_vm2, %v772_v1  ;;  %v800_v2 = vpop.f32.mrb[0].mxu1  ;;  %v371_v3 = vpop.f32.mrb[1].mxu0 }
 0x112   : > { %573 = vst.msk [vmem:[%s1158_s5 + $0x48] sm:$0xff] %vm563_vm2, %v800_v2  ;;  %564 = vst.msk [vmem:[%s1158_s5] sm:$0xff] %vm563_vm2, %v371_v3  ;;  %v524_v4 = vpop.f32.mrb[1].mxu1 }
 0x113   : > { %572 = vst.msk [vmem:[%s1158_s5 + $0x40] sm:$0xff] %vm563_vm2, %v524_v4 }
 0x114   : > { %v775_v5 = vpop.f32.mrb[2].mxu0 }
 0x115   : > { %567 = vst.msk [vmem:[%s1158_s5 + $0x18] sm:$0xff] %vm563_vm2, %v775_v5  ;;  %v803_v6 = vpop.f32.mrb[2].mxu1  ;;  %v381_v7 = vpop.f32.mrb[3].mxu0 }
 0x116   : > { %575 = vst.msk [vmem:[%s1158_s5 + $0x58] sm:$0xff] %vm563_vm2, %v803_v6  ;;  %566 = vst.msk [vmem:[%s1158_s5 + $0x10] sm:$0xff] %vm563_vm2, %v381_v7  ;;  %v534_v8 = vpop.f32.mrb[3].mxu1 }
 0x117   : > { %574 = vst.msk [vmem:[%s1158_s5 + $0x50] sm:$0xff] %vm563_vm2, %v534_v8 }
 0x118   : > { %v778_v9 = vpop.f32.mrb[4].mxu0 }
 0x119   : > { %569 = vst.msk [vmem:[%s1158_s5 + $0x28] sm:$0xff] %vm563_vm2, %v778_v9  ;;  %v806_v10 = vpop.f32.mrb[4].mxu1  ;;  %v391_v11 = vpop.f32.mrb[5].mxu0 }
 0x11a   : > { %577 = vst.msk [vmem:[%s1158_s5 + $0x68] sm:$0xff] %vm563_vm2, %v806_v10  ;;  %568 = vst.msk [vmem:[%s1158_s5 + $0x20] sm:$0xff] %vm563_vm2, %v391_v11  ;;  %v544_v12 = vpop.f32.mrb[5].mxu1 }
 0x11b   : > { %576 = vst.msk [vmem:[%s1158_s5 + $0x60] sm:$0xff] %vm563_vm2, %v544_v12 }
 0x11c   : > { %v781_v13 = vpop.f32.mrb[6].mxu0 }
 0x11d   : > { %571 = vst.msk [vmem:[%s1158_s5 + $0x38] sm:$0xff] %vm563_vm2, %v781_v13  ;;  %v809_v14 = vpop.f32.mrb[6].mxu1  ;;  %v401_v15 = vpop.f32.mrb[7].mxu0 }
 0x11e   : > { %579 = vst.msk [vmem:[%s1158_s5 + $0x78] sm:$0xff] %vm563_vm2, %v809_v14  ;;  %570 = vst.msk [vmem:[%s1158_s5 + $0x30] sm:$0xff] %vm563_vm2, %v401_v15  ;;  %v554_v16 = vpop.f32.mrb[7].mxu1 }
 0x11f   : > { %578 = vst.msk [vmem:[%s1158_s5 + $0x70] sm:$0xff] %vm563_vm2, %v554_v16 }
 0x120   : > { %912 = shalt.err (!%p909_p3)
}
 0x121   : > { %s913_s24 = scalar_lea.hbm %s1189_s10, 2048  ;;  %s917_s27 = scalar_lea.hbm %s1247_s3, 4096 }
 0x122   : > { %p914_p4 = scmp.ne.s32.totalorder %s1189_s10, %s913_s24  ;;  %p918_p9 = scmp.lt.u32.totalorder %s1189_s10, %s1247_s3 }
 0x123   : > { %p919_p10 = scmp.lt.u32.totalorder %s917_s27, %s913_s24  ;;  %p921_p12 = scmp.lt.u32.totalorder %s913_s24, %s1189_s10 }
 0x124   : > { %p915_p7 = pnand %p914_p4, %p1024_p5 }
 0x125   : > { %p920_p11 = por %p919_p10, %p918_p9 }
 0x126   : > { %p916_p8 = pneg %p915_p7 }
 0x127   : > { %p922_p13 = por %p921_p12, %p920_p11 }
 0x129   : > { %p923_p0 = pnand %p922_p13, %p916_p8 }
 0x12b   : > { %926 = shalt.err (!%p923_p0)
}
 0x12c   : > { %s964_s30 = smov 128   ;;  %s965_s4 = smov 8  }
 0x12d   : > { %858 = dma.vmem_to_hbm [thread:$0]  (%p1024_p5), %s1191_s7, 2048, %s1189_s10, %s1203_s16, %s964_s30, %s964_s30, %s965_s4  }
 0x12e PF: > { %p864_p1 = scmp.ge.s32.totalorder %s961_s15, 2  ;;  %s610_s5 = sand.u32 1, %s949_s12  }
 0x12f   : > { %s611_s6 = scalar_lea.sflag [#allocation3], %s610_s5 }
 0x130   : > { %p861_p2 = pnand %p864_p1, %p1028_p6 }
 0x132   : > { %944 = dma.done.wait (!%p861_p2), %s611_s6, 2048  }
 0x133   : > { %946 = vsyncadd (!%p861_p2), %s611_s6, 4294965248  ;;  %p13_p3 = scmp.ge.s32.totalorder %s1011_s18, 4   ;;  %s1252_s12 = smov %s953_s13 }
 0x134   : > { %s1253_s13 = smov %s957_s14  ;;  %s1254_s14 = smov %s1022_s21 }
 0x135   : > { %s1255_s15 = smov %s1011_s18  ;;  %15 = sbr.rel (!%p13_p3) target bundleno = 3 (0x3), region = 70 }
 0x13c   :  { %616 = vsyncpa [#allocation3], 1 }
 0x13d   :  { %618 = vsyncpa [#allocation3 + $0x1], 1 }

</bundles_post_ra>
